<compile_context>
chip_gen: v7x
topology: tpu7x:2x2x1
jax: 0.10.0
libtpu: 0.0.40
codegen_flags: <defaults>
</compile_context>

<pallas_src>
import functools

import jax
import jax.numpy as jnp
import numpy as np
from jax import lax
from jax.experimental import pallas as pl
from jax.experimental.pallas import tpu as pltpu

H = 10                  # Phi hidden width: Linear(1,10) -> Linear(10,1)
SUB, LANE = 8, 128      # one f32 vreg tile
MAX_BATCH = 16          # per-pallas_call x-batch cap (bounds accumulator vregs)


def _acc_rows(batch: int) -> int:
    """Sublane height of the per-chunk quadrature tile."""
    if batch <= 1:
        return 4 * SUB      # 4 vregs of independent work (hides EUP latency)
    if batch <= 4:
        return 2 * SUB
    return SUB              # >=5 x-values already give >=5 independent exp chains


def _make_kernel(n: int, batch: int):
    rows = _acc_rows(batch)
    chunk = rows * LANE
    num_full = n // chunk
    tail = n - num_full * chunk

    def kernel(rt_ref, xs_ref, prm_ref, out_ref):
        # ---- hoisted scalar loads (once per kernel, not per chunk) ----
        a = rt_ref[0]
        h = rt_ref[1]
        lam_h = rt_ref[2]                               # lam * h, folded in wrapper
        xs = [xs_ref[b] for b in range(batch)]
        b2 = prm_ref[0]
        w1 = [prm_ref[1 + j] for j in range(H)]
        b1 = [prm_ref[1 + H + j] for j in range(H)]
        w2 = [prm_ref[1 + 2 * H + j] for j in range(H)]

        # Base quadrature tile, built once: s_base[r,c] = a + h*(idx + 0.5).
        row = lax.broadcasted_iota(jnp.int32, (rows, LANE), 0)
        col = lax.broadcasted_iota(jnp.int32, (rows, LANE), 1)
        base_idx = row * LANE + col                      # kept only for tail mask
        s_base = a + h * (base_idx.astype(jnp.float32) + 0.5)
        chunk_span = h * float(chunk)                    # f32 scalar step per chunk
        bias_tile = jnp.full((rows, LANE), b2, jnp.float32)   # hoisted broadcast

        def phi_of(s):
            # Phi unrolled over the 10 hidden units; pure VPU (MXU not worth it
            # for contraction dims 1 and 10).
            z = bias_tile
            for j in range(H):
                z = z + w2[j] * jnp.maximum(w1[j] * s + b1[j], 0.0)
            return jnp.maximum(z, 0.0)

        def add_contrib(accs, s, mask=None):
            phi = phi_of(s)                              # shared across the batch
            new = []
            for b in range(batch):
                d = xs[b] - s
                v = phi * jnp.exp(-(d * d))              # K(x,s) = exp(-(x-s)^2)
                if mask is not None:
                    v = jnp.where(mask, v, 0.0)
                new.append(accs[b] + v)
            return tuple(new)

        accs = tuple(jnp.zeros((rows, LANE), jnp.float32) for _ in range(batch))

        # ---- full chunks: no masking, no integer work ----
        if num_full > 0:
            if num_full <= 4:
                for c in range(num_full):
                    s_c = s_base if c == 0 else s_base + float(c) * chunk_span
                    accs = add_contrib(accs, s_c)
            else:
                def body(_, carry):
                    off, acc_t = carry
                    acc_t = add_contrib(acc_t, s_base + off)
                    return (off + chunk_span, acc_t)
                _, accs = lax.fori_loop(
                    0, num_full, body,
                    (jnp.zeros((), jnp.float32), accs), unroll=2)

        # ---- single masked tail chunk ----
        if tail > 0:
            s_t = s_base if num_full == 0 else s_base + float(num_full) * chunk_span
            accs = add_contrib(accs, s_t, mask=base_idx < tail)

        # ---- epilogue: one XLU reduction per x, placed lane-wise into (1,B) ----
        lane = lax.broadcasted_iota(jnp.int32, (1, batch), 1)
        result = jnp.zeros((1, batch), jnp.float32)
        for b in range(batch):
            tot = jnp.sum(jnp.sum(accs[b], axis=1, keepdims=True),
                          axis=0, keepdims=True)         # (1, 1)
            result = result + jnp.where(lane == b, tot, 0.0)
        out_ref[...] = lam_h * result

    return kernel


def pack_phi_params(params):
    """Pack Phi parameters once at init into a single SMEM-resident f32[31]:
       [b2, w1[0:10], b1[0:10], w2[0:10]]."""
    return jnp.concatenate([
        jnp.asarray(params["b2"], jnp.float32).reshape(1),
        jnp.asarray(params["w1"], jnp.float32).reshape(H),
        jnp.asarray(params["b1"], jnp.float32).reshape(H),
        jnp.asarray(params["w2"], jnp.float32).reshape(H),
    ])


def _fredholm_call(xs, a, b, lam, packed_params, n):
    """One pallas_call integrating all B x-values; xs is f32[B] with B<=MAX_BATCH."""
    batch = xs.shape[0]
    h = (b - a) / n
    rt = jnp.stack([a, h, lam * h])                       # f32[3] -> SMEM
    out = pl.pallas_call(
        _make_kernel(n, batch),
        out_shape=jax.ShapeDtypeStruct((1, batch), jnp.float32),
        in_specs=[
            pl.BlockSpec(memory_space=pltpu.MemorySpace.SMEM),   # [a, h, lam*h]
            pl.BlockSpec(memory_space=pltpu.MemorySpace.SMEM),   # xs
            pl.BlockSpec(memory_space=pltpu.MemorySpace.SMEM),   # packed Phi params
        ],
        out_specs=pl.BlockSpec(memory_space=pltpu.MemorySpace.VMEM),
        cost_estimate=pl.CostEstimate(
            flops=n * (5 * H + 6 * batch),
            transcendentals=n * batch,
            bytes_accessed=4 * (3 + batch + 1 + 3 * H + batch)),
    )(rt, xs, packed_params)
    return out[0]                                          # (batch,)


@functools.partial(jax.jit, static_argnames=("n",))
def fredholm_forward(x, a, b, lam, packed_params, *, n: int):
    """Single-x forward: mirrors torch FredholmIntegral.forward, returns shape (1,)."""
    xs = jnp.asarray(x, jnp.float32).reshape(1)
    a = jnp.asarray(a, jnp.float32)
    b = jnp.asarray(b, jnp.float32)
    lam = jnp.asarray(lam, jnp.float32)
    return _fredholm_call(xs, a, b, lam, packed_params, n)


@functools.partial(jax.jit, static_argnames=("n",))
def fredholm_forward_batched(xs, a, b, lam, packed_params, *, n: int):
    """Batched-x forward: one kernel launch per <=MAX_BATCH x-values, returns (B,)."""
    xs = jnp.asarray(xs, jnp.float32).reshape(-1)
    a = jnp.asarray(a, jnp.float32)
    b = jnp.asarray(b, jnp.float32)
    lam = jnp.asarray(lam, jnp.float32)
    batch = xs.shape[0]
    if batch <= MAX_BATCH:
        return _fredholm_call(xs, a, b, lam, packed_params, n)
    outs = [_fredholm_call(xs[i:i + MAX_BATCH], a, b, lam, packed_params, n)
            for i in range(0, batch, MAX_BATCH)]
    return jnp.concatenate(outs)


# ---------------- pure-JAX references (mirror the torch semantics) ----------------
def _phi_ref(s_scalar, params):
    h1 = jnp.maximum(params["w1"] * s_scalar + params["b1"], 0.0)          # (10,)
    return jnp.maximum(jnp.dot(params["w2"], h1) + params["b2"][0], 0.0)


def _ref_forward_loop(x, a, b, n, lam, params):
    """Literal mirror of the torch serial loop (small n only)."""
    h = (b - a) / n
    total = 0.0
    for i in range(n):
        s = a + h * (i + 0.5)
        total = total + _phi_ref(s, params) * jnp.exp(-(x - s) ** 2)
    return jnp.asarray([lam * total * h], dtype=jnp.float32)


def _ref_forward_vec(xs, a, b, n, lam, params):
    """Vectorized reference (batched over xs) for larger n."""
    xs = jnp.atleast_1d(jnp.asarray(xs, jnp.float32))
    h = (b - a) / n
    s = a + h * (jnp.arange(n, dtype=jnp.float32) + 0.5)                   # (n,)
    h1 = jnp.maximum(params["w1"][None, :] * s[:, None] + params["b1"][None, :], 0.0)
    phi = jnp.maximum(h1 @ params["w2"] + params["b2"][0], 0.0)            # (n,)
    k = jnp.exp(-(xs[:, None] - s[None, :]) ** 2)                          # (B, n)
    return (lam * h * jnp.sum(k * phi[None, :], axis=1)).astype(jnp.float32)


if __name__ == "__main__":
    key = jax.random.PRNGKey(0)
    k1, k2, k3, k4 = jax.random.split(key, 4)
    bound1 = 1.0                 # Linear(1,10): 1/sqrt(fan_in=1)
    bound2 = 1.0 / np.sqrt(H)    # Linear(10,1): 1/sqrt(fan_in=10)
    params = {
        "w1": jax.random.uniform(k1, (H,), jnp.float32, -bound1, bound1),
        "b1": jax.random.uniform(k2, (H,), jnp.float32, -bound1, bound1),
        "w2": jax.random.uniform(k3, (H,), jnp.float32, -bound2, bound2),
        "b2": jax.random.uniform(k4, (1,), jnp.float32, -bound2, bound2),
    }
    packed = pack_phi_params(params)   # packed once at init (hoisted out of forward)

    # 1) Small n, single x: matches the literal torch loop (tail-only masked chunk).
    x, a, b, n, lam = 0.3, 0.0, 1.0, 8, 0.5
    out = fredholm_forward(x, a, b, lam, packed, n=n)
    jax.block_until_ready(out)
    ref = _ref_forward_loop(x, a, b, n, lam, params)
    np.testing.assert_allclose(np.asarray(out), np.asarray(ref), rtol=1e-5, atol=1e-6)

    # 2) Larger n, single x: statically-unrolled full chunks + masked tail.
    n2 = 9000
    out2 = fredholm_forward(0.7, -1.0, 2.0, 1.3, packed, n=n2)
    jax.block_until_ready(out2)
    ref2 = _ref_forward_vec(jnp.asarray([0.7]), -1.0, 2.0, n2, 1.3, params)
    np.testing.assert_allclose(np.asarray(out2), np.asarray(ref2),
                               rtol=1e-4, atol=1e-5)

    # 3) Batched x (B=8) in a single pallas_call: fori_loop chunk path + tail.
    xs = jax.random.uniform(jax.random.PRNGKey(1), (8,), jnp.float32, -1.0, 2.0)
    n3 = 6000
    out3 = fredholm_forward_batched(xs, -1.0, 2.0, 0.8, packed, n=n3)
    jax.block_until_ready(out3)
    ref3 = _ref_forward_vec(xs, -1.0, 2.0, n3, 0.8, params)
    np.testing.assert_allclose(np.asarray(out3), np.asarray(ref3),
                               rtol=1e-4, atol=1e-5)

    print("KERNEL_OK")
</pallas_src>

<mosaic_0001>
module attributes {stable_mosaic.version = 11 : i64} {
  func.func @kernel(%arg0: memref<3xf32, #tpu.memory_space<smem>>, %arg1: memref<1xf32, #tpu.memory_space<smem>>, %arg2: memref<31xf32, #tpu.memory_space<smem>>, %arg3: memref<1x1xf32, #tpu.memory_space<vmem>>) attributes {dimension_semantics = [], scalar_prefetch = 0 : i64, scratch_operands = 0 : i64, tpu.core_type = #tpu.core_type<tc>} {
    %c0 = arith.constant 0 : index
    %0 = memref.load %arg0[%c0] : memref<3xf32, #tpu.memory_space<smem>>
    %c1 = arith.constant 1 : index
    %1 = memref.load %arg0[%c1] : memref<3xf32, #tpu.memory_space<smem>>
    %c2 = arith.constant 2 : index
    %2 = memref.load %arg0[%c2] : memref<3xf32, #tpu.memory_space<smem>>
    %c0_0 = arith.constant 0 : index
    %3 = memref.load %arg1[%c0_0] : memref<1xf32, #tpu.memory_space<smem>>
    %c0_1 = arith.constant 0 : index
    %4 = memref.load %arg2[%c0_1] : memref<31xf32, #tpu.memory_space<smem>>
    %c1_2 = arith.constant 1 : index
    %5 = memref.load %arg2[%c1_2] : memref<31xf32, #tpu.memory_space<smem>>
    %c2_3 = arith.constant 2 : index
    %6 = memref.load %arg2[%c2_3] : memref<31xf32, #tpu.memory_space<smem>>
    %c3 = arith.constant 3 : index
    %7 = memref.load %arg2[%c3] : memref<31xf32, #tpu.memory_space<smem>>
    %c4 = arith.constant 4 : index
    %8 = memref.load %arg2[%c4] : memref<31xf32, #tpu.memory_space<smem>>
    %c5 = arith.constant 5 : index
    %9 = memref.load %arg2[%c5] : memref<31xf32, #tpu.memory_space<smem>>
    %c6 = arith.constant 6 : index
    %10 = memref.load %arg2[%c6] : memref<31xf32, #tpu.memory_space<smem>>
    %c7 = arith.constant 7 : index
    %11 = memref.load %arg2[%c7] : memref<31xf32, #tpu.memory_space<smem>>
    %c8 = arith.constant 8 : index
    %12 = memref.load %arg2[%c8] : memref<31xf32, #tpu.memory_space<smem>>
    %c9 = arith.constant 9 : index
    %13 = memref.load %arg2[%c9] : memref<31xf32, #tpu.memory_space<smem>>
    %c10 = arith.constant 10 : index
    %14 = memref.load %arg2[%c10] : memref<31xf32, #tpu.memory_space<smem>>
    %c11 = arith.constant 11 : index
    %15 = memref.load %arg2[%c11] : memref<31xf32, #tpu.memory_space<smem>>
    %c12 = arith.constant 12 : index
    %16 = memref.load %arg2[%c12] : memref<31xf32, #tpu.memory_space<smem>>
    %c13 = arith.constant 13 : index
    %17 = memref.load %arg2[%c13] : memref<31xf32, #tpu.memory_space<smem>>
    %c14 = arith.constant 14 : index
    %18 = memref.load %arg2[%c14] : memref<31xf32, #tpu.memory_space<smem>>
    %c15 = arith.constant 15 : index
    %19 = memref.load %arg2[%c15] : memref<31xf32, #tpu.memory_space<smem>>
    %c16 = arith.constant 16 : index
    %20 = memref.load %arg2[%c16] : memref<31xf32, #tpu.memory_space<smem>>
    %c17 = arith.constant 17 : index
    %21 = memref.load %arg2[%c17] : memref<31xf32, #tpu.memory_space<smem>>
    %c18 = arith.constant 18 : index
    %22 = memref.load %arg2[%c18] : memref<31xf32, #tpu.memory_space<smem>>
    %c19 = arith.constant 19 : index
    %23 = memref.load %arg2[%c19] : memref<31xf32, #tpu.memory_space<smem>>
    %c20 = arith.constant 20 : index
    %24 = memref.load %arg2[%c20] : memref<31xf32, #tpu.memory_space<smem>>
    %c21 = arith.constant 21 : index
    %25 = memref.load %arg2[%c21] : memref<31xf32, #tpu.memory_space<smem>>
    %c22 = arith.constant 22 : index
    %26 = memref.load %arg2[%c22] : memref<31xf32, #tpu.memory_space<smem>>
    %c23 = arith.constant 23 : index
    %27 = memref.load %arg2[%c23] : memref<31xf32, #tpu.memory_space<smem>>
    %c24 = arith.constant 24 : index
    %28 = memref.load %arg2[%c24] : memref<31xf32, #tpu.memory_space<smem>>
    %c25 = arith.constant 25 : index
    %29 = memref.load %arg2[%c25] : memref<31xf32, #tpu.memory_space<smem>>
    %c26 = arith.constant 26 : index
    %30 = memref.load %arg2[%c26] : memref<31xf32, #tpu.memory_space<smem>>
    %c27 = arith.constant 27 : index
    %31 = memref.load %arg2[%c27] : memref<31xf32, #tpu.memory_space<smem>>
    %c28 = arith.constant 28 : index
    %32 = memref.load %arg2[%c28] : memref<31xf32, #tpu.memory_space<smem>>
    %c29 = arith.constant 29 : index
    %33 = memref.load %arg2[%c29] : memref<31xf32, #tpu.memory_space<smem>>
    %c30 = arith.constant 30 : index
    %34 = memref.load %arg2[%c30] : memref<31xf32, #tpu.memory_space<smem>>
    %35 = tpu.iota {dimensions = array<i32: 0>} : vector<32x128xi32>
    %36 = tpu.iota {dimensions = array<i32: 1>} : vector<32x128xi32>
    %c128_i32 = arith.constant 128 : i32
    %37 = vector.broadcast %c128_i32 : i32 to vector<32x128xi32>
    %38 = arith.muli %35, %37 : vector<32x128xi32>
    %39 = arith.addi %38, %36 : vector<32x128xi32>
    %40 = arith.sitofp %39 : vector<32x128xi32> to vector<32x128xf32>
    %cst = arith.constant 5.000000e-01 : f32
    %41 = vector.broadcast %cst : f32 to vector<32x128xf32>
    %42 = arith.addf %40, %41 : vector<32x128xf32>
    %43 = vector.broadcast %1 : f32 to vector<32x128xf32>
    %44 = arith.mulf %43, %42 : vector<32x128xf32>
    %45 = vector.broadcast %0 : f32 to vector<32x128xf32>
    %46 = arith.addf %45, %44 : vector<32x128xf32>
    %47 = vector.broadcast %4 : f32 to vector<32x128xf32>
    %cst_4 = arith.constant 0.000000e+00 : f32
    %48 = vector.broadcast %cst_4 : f32 to vector<32x128xf32>
    %c8_i32 = arith.constant 8 : i32
    %49 = vector.broadcast %c8_i32 : i32 to vector<32x128xi32>
    %50 = arith.cmpi slt, %39, %49 : vector<32x128xi32>
    %51 = vector.broadcast %5 : f32 to vector<32x128xf32>
    %52 = arith.mulf %51, %46 : vector<32x128xf32>
    %53 = vector.broadcast %15 : f32 to vector<32x128xf32>
    %54 = arith.addf %52, %53 : vector<32x128xf32>
    %cst_5 = arith.constant 0.000000e+00 : f32
    %55 = vector.broadcast %cst_5 : f32 to vector<32x128xf32>
    %56 = arith.maximumf %54, %55 : vector<32x128xf32>
    %57 = vector.broadcast %25 : f32 to vector<32x128xf32>
    %58 = arith.mulf %57, %56 : vector<32x128xf32>
    %59 = arith.addf %47, %58 : vector<32x128xf32>
    %60 = vector.broadcast %6 : f32 to vector<32x128xf32>
    %61 = arith.mulf %60, %46 : vector<32x128xf32>
    %62 = vector.broadcast %16 : f32 to vector<32x128xf32>
    %63 = arith.addf %61, %62 : vector<32x128xf32>
    %cst_6 = arith.constant 0.000000e+00 : f32
    %64 = vector.broadcast %cst_6 : f32 to vector<32x128xf32>
    %65 = arith.maximumf %63, %64 : vector<32x128xf32>
    %66 = vector.broadcast %26 : f32 to vector<32x128xf32>
    %67 = arith.mulf %66, %65 : vector<32x128xf32>
    %68 = arith.addf %59, %67 : vector<32x128xf32>
    %69 = vector.broadcast %7 : f32 to vector<32x128xf32>
    %70 = arith.mulf %69, %46 : vector<32x128xf32>
    %71 = vector.broadcast %17 : f32 to vector<32x128xf32>
    %72 = arith.addf %70, %71 : vector<32x128xf32>
    %cst_7 = arith.constant 0.000000e+00 : f32
    %73 = vector.broadcast %cst_7 : f32 to vector<32x128xf32>
    %74 = arith.maximumf %72, %73 : vector<32x128xf32>
    %75 = vector.broadcast %27 : f32 to vector<32x128xf32>
    %76 = arith.mulf %75, %74 : vector<32x128xf32>
    %77 = arith.addf %68, %76 : vector<32x128xf32>
    %78 = vector.broadcast %8 : f32 to vector<32x128xf32>
    %79 = arith.mulf %78, %46 : vector<32x128xf32>
    %80 = vector.broadcast %18 : f32 to vector<32x128xf32>
    %81 = arith.addf %79, %80 : vector<32x128xf32>
    %cst_8 = arith.constant 0.000000e+00 : f32
    %82 = vector.broadcast %cst_8 : f32 to vector<32x128xf32>
    %83 = arith.maximumf %81, %82 : vector<32x128xf32>
    %84 = vector.broadcast %28 : f32 to vector<32x128xf32>
    %85 = arith.mulf %84, %83 : vector<32x128xf32>
    %86 = arith.addf %77, %85 : vector<32x128xf32>
    %87 = vector.broadcast %9 : f32 to vector<32x128xf32>
    %88 = arith.mulf %87, %46 : vector<32x128xf32>
    %89 = vector.broadcast %19 : f32 to vector<32x128xf32>
    %90 = arith.addf %88, %89 : vector<32x128xf32>
    %cst_9 = arith.constant 0.000000e+00 : f32
    %91 = vector.broadcast %cst_9 : f32 to vector<32x128xf32>
    %92 = arith.maximumf %90, %91 : vector<32x128xf32>
    %93 = vector.broadcast %29 : f32 to vector<32x128xf32>
    %94 = arith.mulf %93, %92 : vector<32x128xf32>
    %95 = arith.addf %86, %94 : vector<32x128xf32>
    %96 = vector.broadcast %10 : f32 to vector<32x128xf32>
    %97 = arith.mulf %96, %46 : vector<32x128xf32>
    %98 = vector.broadcast %20 : f32 to vector<32x128xf32>
    %99 = arith.addf %97, %98 : vector<32x128xf32>
    %cst_10 = arith.constant 0.000000e+00 : f32
    %100 = vector.broadcast %cst_10 : f32 to vector<32x128xf32>
    %101 = arith.maximumf %99, %100 : vector<32x128xf32>
    %102 = vector.broadcast %30 : f32 to vector<32x128xf32>
    %103 = arith.mulf %102, %101 : vector<32x128xf32>
    %104 = arith.addf %95, %103 : vector<32x128xf32>
    %105 = vector.broadcast %11 : f32 to vector<32x128xf32>
    %106 = arith.mulf %105, %46 : vector<32x128xf32>
    %107 = vector.broadcast %21 : f32 to vector<32x128xf32>
    %108 = arith.addf %106, %107 : vector<32x128xf32>
    %cst_11 = arith.constant 0.000000e+00 : f32
    %109 = vector.broadcast %cst_11 : f32 to vector<32x128xf32>
    %110 = arith.maximumf %108, %109 : vector<32x128xf32>
    %111 = vector.broadcast %31 : f32 to vector<32x128xf32>
    %112 = arith.mulf %111, %110 : vector<32x128xf32>
    %113 = arith.addf %104, %112 : vector<32x128xf32>
    %114 = vector.broadcast %12 : f32 to vector<32x128xf32>
    %115 = arith.mulf %114, %46 : vector<32x128xf32>
    %116 = vector.broadcast %22 : f32 to vector<32x128xf32>
    %117 = arith.addf %115, %116 : vector<32x128xf32>
    %cst_12 = arith.constant 0.000000e+00 : f32
    %118 = vector.broadcast %cst_12 : f32 to vector<32x128xf32>
    %119 = arith.maximumf %117, %118 : vector<32x128xf32>
    %120 = vector.broadcast %32 : f32 to vector<32x128xf32>
    %121 = arith.mulf %120, %119 : vector<32x128xf32>
    %122 = arith.addf %113, %121 : vector<32x128xf32>
    %123 = vector.broadcast %13 : f32 to vector<32x128xf32>
    %124 = arith.mulf %123, %46 : vector<32x128xf32>
    %125 = vector.broadcast %23 : f32 to vector<32x128xf32>
    %126 = arith.addf %124, %125 : vector<32x128xf32>
    %cst_13 = arith.constant 0.000000e+00 : f32
    %127 = vector.broadcast %cst_13 : f32 to vector<32x128xf32>
    %128 = arith.maximumf %126, %127 : vector<32x128xf32>
    %129 = vector.broadcast %33 : f32 to vector<32x128xf32>
    %130 = arith.mulf %129, %128 : vector<32x128xf32>
    %131 = arith.addf %122, %130 : vector<32x128xf32>
    %132 = vector.broadcast %14 : f32 to vector<32x128xf32>
    %133 = arith.mulf %132, %46 : vector<32x128xf32>
    %134 = vector.broadcast %24 : f32 to vector<32x128xf32>
    %135 = arith.addf %133, %134 : vector<32x128xf32>
    %cst_14 = arith.constant 0.000000e+00 : f32
    %136 = vector.broadcast %cst_14 : f32 to vector<32x128xf32>
    %137 = arith.maximumf %135, %136 : vector<32x128xf32>
    %138 = vector.broadcast %34 : f32 to vector<32x128xf32>
    %139 = arith.mulf %138, %137 : vector<32x128xf32>
    %140 = arith.addf %131, %139 : vector<32x128xf32>
    %cst_15 = arith.constant 0.000000e+00 : f32
    %141 = vector.broadcast %cst_15 : f32 to vector<32x128xf32>
    %142 = arith.maximumf %140, %141 : vector<32x128xf32>
    %143 = vector.broadcast %3 : f32 to vector<32x128xf32>
    %144 = arith.subf %143, %46 : vector<32x128xf32>
    %145 = arith.mulf %144, %144 : vector<32x128xf32>
    %cst_16 = arith.constant 0.000000e+00 : f32
    %146 = vector.broadcast %cst_16 : f32 to vector<32x128xf32>
    %147 = arith.subf %146, %145 : vector<32x128xf32>
    %148 = math.exp %147 : vector<32x128xf32>
    %149 = arith.mulf %142, %148 : vector<32x128xf32>
    %cst_17 = arith.constant 0.000000e+00 : f32
    %150 = vector.broadcast %cst_17 : f32 to vector<32x128xf32>
    %151 = arith.select %50, %149, %150 : vector<32x128xi1>, vector<32x128xf32>
    %152 = arith.addf %48, %151 : vector<32x128xf32>
    %153 = tpu.iota {dimensions = array<i32: 1>} : vector<1x1xi32>
    %cst_18 = arith.constant 0.000000e+00 : f32
    %154 = vector.broadcast %cst_18 : f32 to vector<1x1xf32>
    %cst_19 = arith.constant dense<0.000000e+00> : vector<32xf32>
    %155 = vector.multi_reduction <add>, %152, %cst_19 [1] : vector<32x128xf32> to vector<32xf32>
    %156 = vector.shape_cast %155 : vector<32xf32> to vector<32x1xf32>
    %cst_20 = arith.constant dense<0.000000e+00> : vector<1xf32>
    %157 = vector.multi_reduction <add>, %156, %cst_20 [0] : vector<32x1xf32> to vector<1xf32>
    %158 = vector.shape_cast %157 : vector<1xf32> to vector<1x1xf32>
    %c0_i32 = arith.constant 0 : i32
    %159 = vector.broadcast %c0_i32 : i32 to vector<1x1xi32>
    %160 = arith.cmpi eq, %153, %159 : vector<1x1xi32>
    %cst_21 = arith.constant 0.000000e+00 : f32
    %161 = vector.broadcast %cst_21 : f32 to vector<1x1xf32>
    %162 = arith.select %160, %158, %161 : vector<1x1xi1>, vector<1x1xf32>
    %163 = arith.addf %154, %162 : vector<1x1xf32>
    %164 = vector.broadcast %2 : f32 to vector<1x1xf32>
    %165 = arith.mulf %164, %163 : vector<1x1xf32>
    %c0_22 = arith.constant 0 : index
    %c0_23 = arith.constant 0 : index
    %166 = vector.load %arg3[%c0_22, %c0_23] : memref<1x1xf32, #tpu.memory_space<vmem>>, vector<1x1xf32>
    tpu.vector_store %arg3[%c0_22, %c0_23], %165 {strides = array<i32>} : memref<1x1xf32, #tpu.memory_space<vmem>>, vector<1x1xf32>,
    return
  }
}

</mosaic_0001>

<bundles_post_ra>
// kernel: fredholm_forward.1
= control target key start
LH: loop header
LB: loop body
LE: loop exit
PB: predicated region body
PF: predicated region fallthrough
CT: control target
= control target key end

     0   :  { %9 = vsyncpa [#allocation5], 0  ;;  %s903_s0 = inlined_call_operand.vmem [shape: f32[3], index: 0, kind: input, shape index: {}]   ;;  %s904_s1 = inlined_call_operand.<no memory space> [shape: f32[1], index: 1, kind: input, shape index: {}]   ;;  %s905_s2 = inlined_call_operand.vmem [shape: f32[31], index: 2, kind: input, shape index: {}]   ;;  %s906_s3 = inlined_call_operand.hbm [shape: f32[1,1], index: 3, kind: output, shape index: {}]  }
   0x1   :  { %10 = vsyncpa [#allocation7], 0 }
   0x2   :  { %11 = vsyncpa [#allocation4], 0  ;;  %s18_s14 = sshll.u32 %s903_s0, 4  ;;  %s30_s17 = sshll.u32 %s905_s2, 4  ;;  %s19_s14 = int_to_ptr.vmem [resolvable:$true] %s18_s14  ;;  %s31_s17 = int_to_ptr.vmem [resolvable:$true] %s30_s17 }
   0x3   :  { %s464_s18 = scalar_lea.vmem %s19_s14, 16  ;;  %p469_p1 = scmp.lt.s32.totalorder %s19_s14, %s19_s14 }
   0x4   :  { %p465_p0 = scmp.ne.s32.totalorder %s19_s14, %s464_s18  ;;  %p470_p2 = scmp.lt.s32.totalorder %s464_s18, %s464_s18 }
   0x6   :  { %p471_p3 = por %p470_p2, %p469_p1 }
   0x8   :  { %p472_p4 = pnand %p471_p3, %p465_p0 }
   0xa   :  { %475 = shalt.err (!%p472_p4)
}
   0xb   :  { %s516_s19 = smov [#allocation3]   ;;  %s476_s20 = scalar_lea.vmem %s31_s17, 16 }
   0xc   :  { %21 = dma.vmem_to_smem %s19_s14, 16, %s516_s19, [#allocation5]  }
   0xd   :  { %p477_p5 = scmp.ne.s32.totalorder %s31_s17, %s476_s20  ;;  %p481_p6 = scmp.lt.s32.totalorder %s31_s17, %s31_s17 }
   0xe   :  { %p482_p7 = scmp.lt.s32.totalorder %s476_s20, %s476_s20 }
  0x10   :  { %p483_p8 = por %p482_p7, %p481_p6 }
  0x12   :  { %p484_p9 = pnand %p483_p8, %p477_p5 }
  0x14   :  { %487 = shalt.err (!%p484_p9)
}
  0x15   :  { %s517_s0 = smov [#allocation6]  }
  0x16   :  { %33 = dma.vmem_to_smem %s31_s17, 16, %s517_s0, [#allocation7]  }
  0x17   :  { %510 = dma.done.wait [#allocation5], 16  }
  0x18   :  { %511 = vsyncadd [#allocation5], 4294967280 }
  0x19   :  { %512 = dma.done.wait [#allocation7], 16  }
  0x1a   :  { %513 = vsyncadd [#allocation7], 4294967280 }
  0x1b   :  { %40 = sfence }
  0x1c   :  { %s545_s2 = sld [smem:[#allocation3]]  ;;  %s421_s21 = sld [smem:[#allocation3 + $0x1]]  ;;  %v76_v0 = vlaneseq  ;;  %v583_v9 = vstv %s904_s1  ;;  %vm403_vm5 = vcmask 0  }
  0x1d   :  { %s547_s22 = sld [smem:[#allocation6]]  ;;  %s549_s23 = sld [smem:[#allocation6 + $0x1]] }
  0x1e   :  { %s551_s24 = sld [smem:[#allocation6 + $0x2]]  ;;  %s553_s25 = sld [smem:[#allocation6 + $0x3]]  ;;  %v77_v1 = vshrl.u32 %v76_v0, 7  ;;  %v555_v2 = vand.u32 127, %v76_v0 }
  0x1f   :  { %s557_s26 = sld [smem:[#allocation6 + $0x4]]  ;;  %s559_s27 = sld [smem:[#allocation6 + $0x5]] }
  0x20   :  { %910 = vst [vmem:[#allocation12_spill] sm:$0xff] %v555_v2  ;;  %s561_s28 = sld [smem:[#allocation6 + $0x6]]  ;;  %s563_s29 = sld [smem:[#allocation6 + $0x7]]  ;;  %v83_v3 = vmul.u32 128, %v77_v1  ;;  %v79_v4 = vadd.s32 16, %v77_v1  ;;  %v78_v5 = vadd.s32 8, %v77_v1 }
  0x21   :  { %s565_s30 = sld [smem:[#allocation6 + $0x8]]  ;;  %s567_s4 = sld [smem:[#allocation6 + $0x9]]  ;;  %v80_v6 = vadd.s32 24, %v77_v1 }
  0x22   :  { %s569_s5 = sld [smem:[#allocation6 + $0xa]]  ;;  %s571_s6 = sld [smem:[#allocation6 + $0xb]]  ;;  %v574_v7 = vadd.s32 %v83_v3, %v555_v2  ;;  %v85_v8 = vmul.u32 128, %v79_v4  ;;  %v84_v10 = vmul.u32 128, %v78_v5  ;;  %v590_v12 = vstv %s421_s21 }
  0x23   :  { %s576_s7 = sld [smem:[#allocation6 + $0xc]]  ;;  %s578_s8 = sld [smem:[#allocation6 + $0xd]]  ;;  %911 = vst [vmem:[#allocation13_spill] sm:$0xff] %v590_v12  ;;  %v593_v13 = vstv %s545_s2  ;;  %v86_v14 = vmul.u32 128, %v80_v6  ;;  %v600_v15 = vstv %s547_s22  ;;  %v603_v16 = vstv %s549_s23 }
  0x24   :  { %s585_s11 = sld [smem:[#allocation6 + $0xe]]  ;;  %s587_s12 = sld [smem:[#allocation6 + $0xf]]  ;;  %v91_v11 = vcvt.s32.f32 %v574_v7  ;;  %v606_v17 = vadd.s32 %v85_v8, %v555_v2  ;;  %v609_v18 = vadd.s32 %v84_v10, %v555_v2  ;;  %v612_v20 = vstv %s551_s24 }
  0x25   :  { %s595_s13 = sld [smem:[#allocation6 + $0x10]]  ;;  %s597_s1 = sld [smem:[#allocation6 + $0x11]]  ;;  %v615_v21 = vstv %s553_s25  ;;  %v618_v22 = vstv %s557_s26  ;;  %v623_v23 = vstv %s559_s27  ;;  %v642_v30 = vadd.s32 %v86_v14, %v555_v2 }
  0x26   :  { %912 = vst [vmem:[#allocation14_spill] sm:$0xff] %v609_v18  ;;  %v95_v19 = vadd.f32 0.5, %v91_v11  ;;  %s620_s14 = sld [smem:[#allocation6 + $0x15]]  ;;  %v626_v24 = vstv %s561_s28  ;;  %v629_v25 = vstv %s563_s29  ;;  %v93_v26 = vcvt.s32.f32 %v606_v17  ;;  %s632_s15 = sld [smem:[#allocation6 + $0x16]] }
  0x27   :  { %s634_s16 = sld [smem:[#allocation6 + $0x17]]  ;;  %v638_v28 = vstv %s565_s30  ;;  %v92_v29 = vcvt.s32.f32 %v609_v18  ;;  %s644_s17 = sld [smem:[#allocation6 + $0x18]]  ;;  %v652_v32 = vstv %s567_s4  ;;  %vm110_vm0 = vcmp.lt.s32.totalorder %v574_v7, 8 }
  0x28   :  { %v100_v27 = vmul.f32 %v590_v12, %v95_v19  ;;  %s646_s18 = sld [smem:[#allocation6 + $0x19]]  ;;  %v649_v31 = vstv %s571_s6  ;;  %v655_v33 = vstv %s569_s5  ;;  %v97_v34 = vadd.f32 0.5, %v93_v26  ;;  %s669_s19 = sld [smem:[#allocation6 + $0x1a]] }
  0x29   :  { %v661_v36 = vstv %s576_s7  ;;  %v664_v37 = vstv %s578_s8  ;;  %v680_v42 = vadd.f32 0.5, %v92_v29  ;;  %s682_s20 = sld [smem:[#allocation6 + $0x12]]  ;;  %s692_s0 = sld [smem:[#allocation6 + $0x13]]  ;;  %vm112_vm1 = vcmp.lt.s32.totalorder %v606_v17, 8 }
  0x2a   :  { %v658_v35 = vadd.f32 %v593_v13, %v100_v27  ;;  %v667_v38 = vstv %s585_s11  ;;  %v672_v39 = vstv %s587_s12  ;;  %s694_s2 = sld [smem:[#allocation6 + $0x1b]]  ;;  %v102_v50 = vmul.f32 %v590_v12, %v97_v34  ;;  %s704_s21 = sld [smem:[#allocation6 + $0x1c]] }
  0x2b   :  { %v675_v40 = vstv %s595_s13  ;;  %v678_v41 = vstv %s597_s1  ;;  %s711_s22 = sld [smem:[#allocation6 + $0x14]]  ;;  %s713_s23 = sld [smem:[#allocation6 + $0x1d]]  ;;  %vm113_vm3 = vcmp.lt.s32.totalorder %v642_v30, 8 }
  0x2c   :  { %v115_v43 = vmul.f32 %v603_v16, %v658_v35  ;;  %v138_v44 = vmul.f32 %v612_v20, %v658_v35  ;;  %v161_v45 = vmul.f32 %v615_v21, %v658_v35  ;;  %v184_v46 = vmul.f32 %v618_v22, %v658_v35  ;;  %s726_s24 = sld [smem:[#allocation6 + $0x1e]]  ;;  %s422_s25 = sld [smem:[#allocation3 + $0x2]] }
  0x2d   :  { %v697_v47 = vstv %s620_s14  ;;  %v207_v48 = vmul.f32 %v623_v23, %v658_v35  ;;  %v230_v49 = vmul.f32 %v626_v24, %v658_v35  ;;  %v253_v54 = vmul.f32 %v629_v25, %v658_v35  ;;  %s518_s26 = smov [#allocation8]  }
  0x2e   :  { %v120_v51 = vadd.f32 %v649_v31, %v115_v43  ;;  %v143_v52 = vadd.f32 %v661_v36, %v138_v44  ;;  %v166_v53 = vadd.f32 %v664_v37, %v161_v45  ;;  %v716_v55 = vstv %s632_s15  ;;  %s411_s27 = sshll.u32 %s518_s26, 4  ;;  %s412_s27 = int_to_ptr.vmem [resolvable:$true] %s411_s27 }
  0x2f   :  { %v719_v56 = vstv %s634_s16  ;;  %v189_v57 = vadd.f32 %v667_v38, %v184_v46  ;;  %v212_v58 = vadd.f32 %v672_v39, %v207_v48  ;;  %v724_v62 = vstv %s644_s17  ;;  %s488_s28 = scalar_lea.vmem %s412_s27, 16  ;;  %s492_s29 = scalar_lea.vmem %s412_s27, 32 }
  0x30   :  { %v124_v59 = vmax.f32 %v120_v51, 0.0  ;;  %v147_v60 = vmax.f32 %v143_v52, 0.0  ;;  %v170_v61 = vmax.f32 %v166_v53, 0.0  ;;  %v729_v1 = vstv %s646_s18  ;;  %p489_p10 = scmp.ne.s32.totalorder %s412_s27, %s488_s28  ;;  %p493_p11 = scmp.lt.s32.totalorder %s412_s27, %s412_s27 }
  0x31   :  { %v193_v63 = vmax.f32 %v189_v57, 0.0  ;;  %v216_v0 = vmax.f32 %v212_v58, 0.0  ;;  %v235_v3 = vadd.f32 %v675_v40, %v230_v49  ;;  %v258_v6 = vadd.f32 %v678_v41, %v253_v54  ;;  %p494_p12 = scmp.lt.s32.totalorder %s492_s29, %s488_s28 }
  0x32   :  { %v129_v4 = vmul.f32 %v697_v47, %v124_v59  ;;  %v152_v5 = vmul.f32 %v716_v55, %v147_v60  ;;  %v175_v10 = vmul.f32 %v719_v56, %v170_v61  ;;  %v739_v19 = vstv %s669_s19 }
  0x33   :  { %v198_v11 = vmul.f32 %v724_v62, %v193_v63  ;;  %v239_v14 = vmax.f32 %v235_v3, 0.0  ;;  %v221_v27 = vmul.f32 %v729_v1, %v216_v0  ;;  %v276_v29 = vmul.f32 %v638_v28, %v658_v35  ;;  %p495_p13 = por %p494_p12, %p493_p11 }
  0x34   :  { %v133_v26 = vadd.f32 %v129_v4, %v600_v15  ;;  %v746_v34 = vstv %s682_s20  ;;  %v262_v43 = vmax.f32 %v258_v6, 0.0  ;;  %v749_v44 = vstv %s694_s2 }
  0x35   :  { %v299_v45 = vmul.f32 %v652_v32, %v658_v35  ;;  %v754_v46 = vstv %s692_s0  ;;  %v244_v49 = vmul.f32 %v739_v19, %v239_v14  ;;  %v281_v51 = vadd.f32 %v746_v34, %v276_v29  ;;  %p496_p0 = pnand %p495_p13, %p489_p10 }
  0x36   :  { %v156_v48 = vadd.f32 %v152_v5, %v133_v26  ;;  %v759_v52 = vstv %s704_s21  ;;  %v763_v54 = vstv %s713_s23  ;;  %v322_v57 = vmul.f32 %v655_v33, %v658_v35 }
  0x37   :  { %v304_v53 = vadd.f32 %v754_v46, %v299_v45  ;;  %v768_v58 = vstv %s711_s22  ;;  %v285_v60 = vmax.f32 %v281_v51, 0.0  ;;  %v349_v61 = vsub.f32 %v583_v9, %v658_v35 }
  0x38   :  { %v179_v59 = vadd.f32 %v175_v10, %v156_v48  ;;  %v107_v63 = vadd.f32 %v593_v13, %v102_v50  ;;  %v267_v0 = vmul.f32 %v749_v44, %v262_v43  ;;  %v327_v4 = vadd.f32 %v768_v58, %v322_v57 }
  0x39   :  { %v308_v3 = vmax.f32 %v304_v53, 0.0  ;;  %v776_v5 = vstv %s726_s24  ;;  %v353_v14 = vmul.f32 %v349_v61, %v349_v61  ;;  %v101_v10 = vmul.f32 %v590_v12, %v680_v42 }
  0x3a   :  { %v202_v6 = vadd.f32 %v198_v11, %v179_v59  ;;  %v117_v26 = vmul.f32 %v603_v16, %v107_v63  ;;  %v290_v29 = vmul.f32 %v759_v52, %v285_v60  ;;  %v140_v50 = vmul.f32 %v612_v20, %v107_v63 }
  0x3b   :  { %v313_v35 = vmul.f32 %v763_v54, %v308_v3  ;;  %v163_v43 = vmul.f32 %v615_v21, %v107_v63  ;;  %v357_v48 = vsub.f32 0.0, %v353_v14  ;;  %v186_v11 = vmul.f32 %v618_v22, %v107_v63 }
  0x3c   :  { %v225_v45 = vadd.f32 %v221_v27, %v202_v6  ;;  %v122_v51 = vadd.f32 %v649_v31, %v117_v26  ;;  %v331_v53 = vmax.f32 %v327_v4, 0.0  ;;  %v145_v57 = vadd.f32 %v661_v36, %v140_v50 }
  0x3d   :  { %v168_v59 = vadd.f32 %v664_v37, %v163_v43  ;;  %v209_v42 = vmul.f32 %v623_v23, %v107_v63  ;;  %v361_v61 = vmul.f32 1.442695, %v357_v48  ;;  %v191_v8 = vadd.f32 %v667_v38, %v186_v11 }
  0x3e   :  { %v248_v60 = vadd.f32 %v244_v49, %v225_v45  ;;  %v126_v3 = vmax.f32 %v122_v51, 0.0  ;;  %v149_v2 = vmax.f32 %v145_v57, 0.0  ;;  %v232_v6 = vmul.f32 %v626_v24, %v107_v63 }
  0x3f   :  { %v172_v18 = vmax.f32 %v168_v59, 0.0  ;;  %v214_v27 = vadd.f32 %v672_v39, %v209_v42  ;;  %456 = vpow2.f32 %v361_v61  ;;  %v195_v26 = vmax.f32 %v191_v8, 0.0 }
  0x40   :  { %v271_v14 = vadd.f32 %v267_v0, %v248_v60  ;;  %v131_v4 = vmul.f32 %v697_v47, %v126_v3  ;;  %v336_v50 = vmul.f32 %v776_v5, %v331_v53  ;;  %v154_v43 = vmul.f32 %v716_v55, %v149_v2 }
  0x41   :  { %v218_v49 = vmax.f32 %v214_v27, 0.0  ;;  %v237_v45 = vadd.f32 %v675_v40, %v232_v6  ;;  %v177_v11 = vmul.f32 %v719_v56, %v172_v18  ;;  %v255_v0 = vmul.f32 %v629_v25, %v107_v63 }
  0x42   :  { %v294_v48 = vadd.f32 %v290_v29, %v271_v14  ;;  %v135_v51 = vadd.f32 %v131_v4, %v600_v15  ;;  %v200_v57 = vmul.f32 %v724_v62, %v195_v26  ;;  %v278_v8 = vmul.f32 %v638_v28, %v107_v63 }
  0x43   :  { %v241_v59 = vmax.f32 %v237_v45, 0.0  ;;  %v301_v53 = vmul.f32 %v652_v32, %v107_v63  ;;  %v260_v60 = vadd.f32 %v678_v41, %v255_v0  ;;  %v324_v61 = vmul.f32 %v655_v33, %v107_v63 }
  0x44   :  { %v317_v2 = vadd.f32 %v313_v35, %v294_v48  ;;  %v158_v42 = vadd.f32 %v154_v43, %v135_v51  ;;  %v223_v29 = vmul.f32 %v729_v1, %v218_v49  ;;  %v283_v3 = vadd.f32 %v746_v34, %v278_v8 }
  0x45   :  { %v306_v18 = vadd.f32 %v754_v46, %v301_v53  ;;  %v351_v27 = vsub.f32 %v583_v9, %v107_v63  ;;  %v264_v4 = vmax.f32 %v260_v60, 0.0  ;;  %v329_v26 = vadd.f32 %v768_v58, %v324_v61 }
  0x46   :  { %v340_v6 = vadd.f32 %v336_v50, %v317_v2  ;;  %v181_v14 = vadd.f32 %v177_v11, %v158_v42  ;;  %v287_v45 = vmax.f32 %v283_v3, 0.0  ;;  %v106_v48 = vadd.f32 %v593_v13, %v101_v10 }
  0x47   :  { %v310_v35 = vmax.f32 %v306_v18, 0.0  ;;  %v355_v43 = vmul.f32 %v351_v27, %v351_v27  ;;  %v246_v49 = vmul.f32 %v739_v19, %v241_v59  ;;  %v269_v8 = vmul.f32 %v749_v44, %v264_v4 }
  0x48   :  { %v344_v51 = vmax.f32 %v340_v6, 0.0  ;;  %v204_v0 = vadd.f32 %v200_v57, %v181_v14  ;;  %v292_v53 = vmul.f32 %v759_v52, %v287_v45  ;;  %v333_v12 = vmax.f32 %v329_v26, 0.0 }
  0x49   :  { %v359_v63 = vsub.f32 0.0, %v355_v43  ;;  %v116_v50 = vmul.f32 %v603_v16, %v106_v48  ;;  %v457_v11 = vpop.eup %456  ;;  %v315_v42 = vmul.f32 %v763_v54, %v310_v35  ;;  %v139_v60 = vmul.f32 %v612_v20, %v106_v48 }
  0x4a   :  { %v227_v2 = vadd.f32 %v223_v29, %v204_v0  ;;  %v162_v10 = vmul.f32 %v615_v21, %v106_v48  ;;  %v369_v61 = vmul.f32 %v457_v11, %v344_v51  ;;  %v185_v3 = vmul.f32 %v618_v22, %v106_v48 }
  0x4b   :  { %v365_v57 = vmul.f32 1.442695, %v359_v63  ;;  %v121_v59 = vadd.f32 %v649_v31, %v116_v50  ;;  %v144_v27 = vadd.f32 %v661_v36, %v139_v60  ;;  %v208_v14 = vmul.f32 %v623_v23, %v106_v48 }
  0x4c   :  { %v250_v18 = vadd.f32 %v246_v49, %v227_v2  ;;  %v167_v6 = vadd.f32 %v664_v37, %v162_v10  ;;  %v373_v29 = vsel %vm110_vm0, %v369_v61, 0.0  ;;  %v190_v26 = vadd.f32 %v667_v38, %v185_v3 }
  0x4d   :  { %458 = vpow2.f32 %v365_v57  ;;  %v125_v4 = vmax.f32 %v121_v59, 0.0  ;;  %381 = vadd.xlane.f32.xlu0 %v373_v29  ;;  %v148_v35 = vmax.f32 %v144_v27, 0.0  ;;  %v213_v51 = vadd.f32 %v672_v39, %v208_v14 }
  0x4e   :  { %v273_v45 = vadd.f32 %v269_v8, %v250_v18  ;;  %v171_v43 = vmax.f32 %v167_v6, 0.0  ;;  %v194_v49 = vmax.f32 %v190_v26, 0.0  ;;  %v231_v63 = vmul.f32 %v626_v24, %v106_v48 }
  0x4f   :  { %v130_v0 = vmul.f32 %v697_v47, %v125_v4  ;;  %v254_v50 = vmul.f32 %v629_v25, %v106_v48  ;;  %v338_v7 = vmul.f32 %v776_v5, %v333_v12  ;;  %v153_v2 = vmul.f32 %v716_v55, %v148_v35 }
  0x50   :  { %v296_v11 = vadd.f32 %v292_v53, %v273_v45  ;;  %v176_v60 = vmul.f32 %v719_v56, %v171_v43  ;;  %v217_v10 = vmax.f32 %v213_v51, 0.0  ;;  %v236_v61 = vadd.f32 %v675_v40, %v231_v63 }
  0x51   :  { %v134_v8 = vadd.f32 %v130_v0, %v600_v15  ;;  %v259_v57 = vadd.f32 %v678_v41, %v254_v50  ;;  %v277_v3 = vmul.f32 %v638_v28, %v106_v48  ;;  %v300_v18 = vmul.f32 %v652_v32, %v106_v48 }
  0x52   :  { %v319_v59 = vadd.f32 %v315_v42, %v296_v11  ;;  %v913_v53 = vcvt.s32.f32 %v642_v30  ;;  %v199_v6 = vmul.f32 %v724_v62, %v194_v49  ;;  %v240_v14 = vmax.f32 %v236_v61, 0.0  ;;  %v914_v61 = vld [vmem:[#allocation13_spill] sm:$0xff] }
  0x53   :  { %v157_v12 = vadd.f32 %v153_v2, %v134_v8  ;;  %v323_v29 = vmul.f32 %v655_v33, %v106_v48  ;;  %v282_v26 = vadd.f32 %v746_v34, %v277_v3  ;;  %v305_v45 = vadd.f32 %v754_v46, %v300_v18 }
  0x54   :  { %v98_v27 = vadd.f32 0.5, %v913_v53  ;;  %v342_v4 = vadd.f32 %v338_v7, %v319_v59  ;;  %v350_v42 = vsub.f32 %v583_v9, %v106_v48  ;;  %v222_v43 = vmul.f32 %v729_v1, %v217_v10 }
  0x55   :  { %v180_v35 = vadd.f32 %v176_v60, %v157_v12  ;;  %v263_v51 = vmax.f32 %v259_v57, 0.0  ;;  %v328_v0 = vadd.f32 %v768_v58, %v323_v29  ;;  %v286_v50 = vmax.f32 %v282_v26, 0.0 }
  0x56   :  { %v346_v63 = vmax.f32 %v342_v4, 0.0  ;;  %v309_v11 = vmax.f32 %v305_v45, 0.0  ;;  %v354_v49 = vmul.f32 %v350_v42, %v350_v42  ;;  %v245_v8 = vmul.f32 %v739_v19, %v240_v14 }
  0x57   :  { %v459_v2 = vpop.eup %458  ;;  %v203_v7 = vadd.f32 %v199_v6, %v180_v35  ;;  %v103_v59 = vmul.f32 %v914_v61, %v98_v27  ;;  %v268_v10 = vmul.f32 %v749_v44, %v263_v51  ;;  %v332_v57 = vmax.f32 %v328_v0, 0.0 }
  0x58   :  { %v371_v3 = vmul.f32 %v459_v2, %v346_v63  ;;  %v358_v48 = vsub.f32 0.0, %v354_v49  ;;  %v291_v12 = vmul.f32 %v759_v52, %v286_v50  ;;  %v314_v29 = vmul.f32 %v763_v54, %v309_v11 }
  0x59   :  { %v226_v60 = vadd.f32 %v222_v43, %v203_v7  ;;  %v108_v18 = vadd.f32 %v593_v13, %v103_v59  ;;  %v401_v30 = vstv %s422_s25 }
  0x5a   :  { %v375_v53 = vsel %vm112_vm1, %v371_v3, 0.0  ;;  %v363_v4 = vmul.f32 1.442695, %v358_v48 }
  0x5b   :  { %385 = vadd.xlane.f32.xlu1 %v375_v53  ;;  %v249_v17 = vadd.f32 %v245_v8, %v226_v60  ;;  %v118_v6 = vmul.f32 %v603_v16, %v108_v18  ;;  %v141_v27 = vmul.f32 %v612_v20, %v108_v18  ;;  %v164_v14 = vmul.f32 %v615_v21, %v108_v18 }
  0x5c   :  { %460 = vpow2.f32 %v363_v4  ;;  %v187_v26 = vmul.f32 %v618_v22, %v108_v18  ;;  %v210_v45 = vmul.f32 %v623_v23, %v108_v18  ;;  %v233_v13 = vmul.f32 %v626_v24, %v108_v18 }
  0x5d   :  { %v272_v42 = vadd.f32 %v268_v10, %v249_v17  ;;  %v123_v35 = vadd.f32 %v649_v31, %v118_v6  ;;  %v146_v43 = vadd.f32 %v661_v36, %v141_v27  ;;  %v169_v51 = vadd.f32 %v664_v37, %v164_v14 }
  0x5e   :  { %v337_v16 = vmul.f32 %v776_v5, %v332_v57  ;;  %v192_v20 = vadd.f32 %v667_v38, %v187_v26  ;;  %v215_v21 = vadd.f32 %v672_v39, %v210_v45  ;;  %v256_v0 = vmul.f32 %v629_v25, %v108_v18 }
  0x5f   :  { %v295_v22 = vadd.f32 %v291_v12, %v272_v42  ;;  %v127_v63 = vmax.f32 %v123_v35, 0.0  ;;  %v150_v23 = vmax.f32 %v146_v43, 0.0  ;;  %v173_v50 = vmax.f32 %v169_v51, 0.0 }
  0x60   :  { %v196_v24 = vmax.f32 %v192_v20, 0.0  ;;  %v238_v11 = vadd.f32 %v675_v40, %v233_v13  ;;  %v219_v2 = vmax.f32 %v215_v21, 0.0  ;;  %v261_v38 = vadd.f32 %v678_v41, %v256_v0  ;;  %v915_v41 = vld [vmem:[#allocation14_spill] sm:$0xff] }
  0x61   :  { %v318_v31 = vadd.f32 %v314_v29, %v295_v22  ;;  %v132_v36 = vmul.f32 %v697_v47, %v127_v63  ;;  %v155_v37 = vmul.f32 %v716_v55, %v150_v23  ;;  %v178_v49 = vmul.f32 %v719_v56, %v173_v50  ;;  %v916_v50 = vld [vmem:[#allocation12_spill] sm:$0xff] }
  0x62   :  { %v279_v7 = vmul.f32 %v638_v28, %v108_v18  ;;  %v302_v8 = vmul.f32 %v652_v32, %v108_v18  ;;  %v201_v61 = vmul.f32 %v724_v62, %v196_v24  ;;  %v242_v40 = vmax.f32 %v238_v11, 0.0 }
  0x63   :  { %v341_v39 = vadd.f32 %v337_v16, %v318_v31  ;;  %v136_v25 = vadd.f32 %v132_v36, %v600_v15  ;;  %v352_v59 = vsub.f32 %v583_v9, %v108_v18  ;;  %v325_v56 = vmul.f32 %v655_v33, %v108_v18 }
  0x64   :  { %v284_v55 = vadd.f32 %v746_v34, %v279_v7  ;;  %vm111_vm2 = vcmp.lt.s32.totalorder %v915_v41, 8  ;;  %v224_v15 = vmul.f32 %v729_v1, %v219_v2  ;;  %v265_v32 = vmax.f32 %v261_v38, 0.0 }
  0x65   :  { %v345_v47 = vmax.f32 %v341_v39, 0.0  ;;  %v159_v3 = vadd.f32 %v155_v37, %v136_v25  ;;  %v356_v60 = vmul.f32 %v352_v59, %v352_v59  ;;  %v307_v62 = vadd.f32 %v754_v46, %v302_v8 }
  0x66   :  { %v461_v48 = vpop.eup %460  ;;  %v247_v57 = vmul.f32 %v739_v19, %v242_v40  ;;  %v288_v29 = vmax.f32 %v284_v55, 0.0  ;;  %v330_v34 = vadd.f32 %v768_v58, %v325_v56  ;;  %v270_v4 = vmul.f32 %v749_v44, %v265_v32 }
  0x67   :  { %v370_v28 = vmul.f32 %v461_v48, %v345_v47  ;;  %v182_v10 = vadd.f32 %v178_v49, %v159_v3  ;;  %v360_v9 = vsub.f32 0.0, %v356_v60  ;;  %v311_v1 = vmax.f32 %v307_v62, 0.0 }
  0x68   :  { %v293_v6 = vmul.f32 %v759_v52, %v288_v29  ;;  %v334_v27 = vmax.f32 %v330_v34, 0.0  ;;  %vm398_vm4 = vcmp.eq.s32.totalorder %v916_v50, 0 }
  0x69   :  { %v374_v53 = vsel %vm111_vm2, %v370_v28, 0.0  ;;  %v205_v12 = vadd.f32 %v201_v61, %v182_v10  ;;  %v367_v33 = vmul.f32 1.442695, %v360_v9  ;;  %v316_v19 = vmul.f32 %v763_v54, %v311_v1 }
  0x6a   :  { %383 = vadd.xlane.f32.xlu0 %v374_v53  ;;  %v339_v26 = vmul.f32 %v776_v5, %v334_v27 }
  0x6b   :  { %v228_v18 = vadd.f32 %v224_v15, %v205_v12  ;;  %462 = vpow2.f32 %v367_v33 }
  0x6d   :  { %v251_v17 = vadd.f32 %v247_v57, %v228_v18 }
  0x6f   :  { %v274_v46 = vadd.f32 %v270_v4, %v251_v17 }
  0x71   :  { %v297_v14 = vadd.f32 %v293_v6, %v274_v46 }
  0x73   :  { %v320_v45 = vadd.f32 %v316_v19, %v297_v14 }
  0x75   :  { %v343_v13 = vadd.f32 %v339_v26, %v320_v45  ;;  %v463_v58 = vpop.eup %462 }
  0x77   :  { %v347_v42 = vmax.f32 %v343_v13, 0.0 }
  0x79   :  { %v372_v35 = vmul.f32 %v463_v58, %v347_v42 }
  0x7b   :  { %v376_v44 = vsel %vm113_vm3, %v372_v35, 0.0 }
  0x7c   :  { %387 = vadd.xlane.f32.xlu1 %v376_v44 }
  0xda   :  { %v382_v43 = vpop.xlane.xlu0 %381 }
  0xe8   :  { %v386_v52 = vpop.xlane.xlu1 %385 }
  0xf7   :  { %v384_v51 = vpop.xlane.xlu0 %383 }
  0xf8   :  { %v389_v16 = vadd.f32 %v384_v51, %v382_v43 }
  0xfa   :  { %v390_v20 = vadd.f32 %v389_v16, %v386_v52 }
 0x109   :  { %v388_v21 = vpop.xlane.xlu1 %387 }
 0x10a   :  { %v391_v0 = vadd.f32 %v390_v20, %v388_v21 }
 0x10c   :  { %v392_v54 = vrot.slane %v391_v0, 4 }
 0x10e   :  { %v393_v22 = vadd.f32 %v392_v54, %v391_v0 }
 0x110   :  { %v394_v5 = vrot.slane %v393_v22, 2 }
 0x112   :  { %v395_v63 = vadd.f32 %v394_v5, %v393_v22 }
 0x114   :  { %v396_v23 = vrot.slane %v395_v63, 1 }
 0x116   :  { %v397_v24 = vadd.f32 %v396_v23, %v395_v63 }
 0x118   :  { %v399_v11 = vsel %vm398_vm4, %v397_v24, 0.0 }
 0x119   :  { %v402_v31 = vmul.f32 %v401_v30, %v399_v11 }
 0x11b   :  { %404 = vst.msk [vmem:[#allocation8] sm:$0x1] %vm403_vm5, %v402_v31 }
 0x11c   :  { %499 = shalt.err (!%p496_p0)
}
 0x11d   :  { %s500_s5 = scalar_lea.hbm %s906_s3, 16 }
 0x11e   :  { %p501_p1 = scmp.ne.s32.totalorder %s906_s3, %s500_s5  ;;  %p504_p2 = scmp.lt.u32.totalorder %s500_s5, %s906_s3 }
 0x120   :  { %p506_p3 = pnand %p504_p2, %p501_p1 }
 0x122   :  { %509 = shalt.err (!%p506_p3)
}
 0x123   :  { %414 = dma.vmem_to_hbm [thread:$0]  %s412_s27, 16, %s906_s3, [#allocation4]  }
 0x124   :  { %514 = dma.done.wait [#allocation4], 16  }
 0x125   :  { %515 = vsyncadd [#allocation4], 4294967280 }
 0x126   :  { %418 = vsyncpa [#allocation4], 1 }
 0x127   :  { %419 = vsyncpa [#allocation5], 1 }
 0x128   :  { %420 = vsyncpa [#allocation7], 1 }

</bundles_post_ra>
